<compile_context>
chip_gen: v7x
topology: tpu7x:2x2x1
jax: 0.10.0
libtpu: 0.0.40
codegen_flags: <defaults>
</compile_context>

<pallas_src>
import jax
import jax.numpy as jnp
from jax.experimental import pallas as pl
from jax.experimental.pallas import tpu as pltpu


# ---------------------------------------------------------------------------
# Kernel
# ---------------------------------------------------------------------------
def _fused_heads_kernel(x_ref, w_ref, b_ref, o_ref, acc_ref):
    """One (tm, tn) output tile: accumulate over the K (feature) grid axis."""
    k = pl.program_id(2)

    @pl.when(k == 0)
    def _():
        acc_ref[...] = jnp.zeros_like(acc_ref)

    acc_ref[...] += jnp.dot(
        x_ref[...], w_ref[...], preferred_element_type=jnp.float32
    )

    @pl.when(k == pl.num_programs(2) - 1)
    def _():
        o_ref[...] = (acc_ref[...] + b_ref[...].astype(jnp.float32)).astype(
            o_ref.dtype
        )


# ---------------------------------------------------------------------------
# Wrapper helpers
# ---------------------------------------------------------------------------
def _round_up(x, m):
    return ((x + m - 1) // m) * m


def _pick_tn(ctot):
    # Lane-dense class tiles: 256-wide on large problems (v6e/v7x MXU is
    # 2x256x256), 128 minimum.
    if ctot <= 256:
        return _round_up(ctot, 128)
    return 256


def _pick_tk(d):
    # Keep the full feature dim per tile when it comfortably fits VMEM,
    # otherwise stream it in 512-wide chunks (multiple of 128 => aligned).
    if d <= 2048:
        return _round_up(d, 8)
    return 512


def _pick_tm(b):
    if b <= 256:
        return _round_up(b, 8)
    return 256


def _pad_to(x, shape):
    pads = [(0, t - s) for s, t in zip(x.shape, shape)]
    if all(p == (0, 0) for p in pads):
        return x
    return jnp.pad(x, pads)


def fused_linear_heads(x, w_cat, b_cat, *, out_dtype):
    """y = x @ w_cat + b_cat with a tiled, fused Pallas matmul.

    x:     (B, D)       activations (already cast to compute dtype)
    w_cat: (Dp, Cp)     concatenated + padded weights, feature dim padded to tk
    b_cat: (1, Cp)      concatenated + padded bias (f32)
    Returns (B_pad, Cp); caller slices out the valid region.
    """
    B, D = x.shape
    Dp, Cp = w_cat.shape

    tm = _pick_tm(B)
    tn = _pick_tn(Cp)
    tk = _pick_tk(Dp)
    assert Cp % tn == 0 and Dp % tk == 0

    Bp = _round_up(B, tm)
    x_p = _pad_to(x, (Bp, Dp))

    grid = (Bp // tm, Cp // tn, Dp // tk)

    flops = 2 * Bp * Dp * Cp
    bytes_accessed = (
        Bp * Dp * x_p.dtype.itemsize
        + Dp * Cp * w_cat.dtype.itemsize
        + Cp * b_cat.dtype.itemsize
        + Bp * Cp * jnp.dtype(out_dtype).itemsize
    )

    y_p = pl.pallas_call(
        _fused_heads_kernel,
        out_shape=jax.ShapeDtypeStruct((Bp, Cp), out_dtype),
        grid_spec=pltpu.PrefetchScalarGridSpec(
            num_scalar_prefetch=0,
            grid=grid,
            in_specs=[
                # x tile is keyed only on (i, k): stays resident across the
                # class axis j, so the shared input is loaded once per (i, k).
                pl.BlockSpec((tm, tk), lambda i, j, k: (i, k)),
                pl.BlockSpec((tk, tn), lambda i, j, k: (k, j)),
                pl.BlockSpec((1, tn), lambda i, j, k: (0, j)),
            ],
            out_specs=pl.BlockSpec((tm, tn), lambda i, j, k: (i, j)),
            scratch_shapes=[pltpu.VMEM((tm, tn), jnp.float32)],
        ),
        compiler_params=pltpu.CompilerParams(
            dimension_semantics=("parallel", "parallel", "arbitrary"),
        ),
        cost_estimate=pl.CostEstimate(
            flops=flops, transcendentals=0, bytes_accessed=bytes_accessed
        ),
    )(x_p, w_cat, b_cat)
    return y_p


# ---------------------------------------------------------------------------
# Module
# ---------------------------------------------------------------------------
class AllClassifiers:
    """JAX/Pallas port of models/dino.py::AllClassifiers.

    classifiers: dict name -> (w, b) with PyTorch nn.Linear layout:
      w: (C_k, D), b: (C_k,).  All heads share the feature dim D.

    All heads are fused into one (D, sum C_k) matmul; per-head results are
    slices of the fused output at the original (unpadded) class offsets.
    """

    def __init__(self, classifiers, compute_dtype=jnp.float32):
        names = list(classifiers.keys())
        ws, bs = [], []
        self.offsets = {}
        off = 0
        D = None
        for name in names:
            w, b = classifiers[name]
            w = jnp.asarray(w)            # (C, D)
            b = jnp.asarray(b)            # (C,)
            C, d = w.shape
            if D is None:
                D = d
            assert d == D, "all DINO linear-probe heads share the feature dim"
            ws.append(w.T)                # (D, C)
            bs.append(b)
            self.offsets[name] = (off, C)
            off += C

        self.D = D
        self.Ctot = off
        self.compute_dtype = compute_dtype

        # Pad once at construction: feature dim to a multiple of tk, class dim
        # to a lane-dense multiple of tn.  Padded columns have zero weight and
        # zero bias and are sliced off, so they never affect results.
        tk = _pick_tk(D)
        tn = _pick_tn(off)
        Dp = _round_up(D, tk)
        Cp = _round_up(off, tn)
        self.Dp = Dp

        w_cat = jnp.concatenate(ws, axis=1)              # (D, Ctot)
        b_cat = jnp.concatenate(bs).reshape(1, -1)       # (1, Ctot)
        self.w_cat = _pad_to(w_cat, (Dp, Cp)).astype(compute_dtype)
        self.b_cat = _pad_to(b_cat, (1, Cp)).astype(jnp.float32)  # bias in f32

    def __call__(self, inputs):
        B = inputs.shape[0]
        out_dtype = inputs.dtype
        x = _pad_to(inputs, (B, self.Dp)).astype(self.compute_dtype)
        y = fused_linear_heads(x, self.w_cat, self.b_cat, out_dtype=out_dtype)
        # Slice per-head outputs at the *unpadded* concatenation offsets.
        return {
            name: y[:B, off:off + C]
            for name, (off, C) in self.offsets.items()
        }

    def __len__(self):
        return len(self.offsets)


# ---------------------------------------------------------------------------
# Reference + demo
# ---------------------------------------------------------------------------
def _ref_forward(classifiers, x):
    # Pure-JAX reference with PyTorch-layout weights: y = x @ W.T + b.
    return {k: x @ jnp.asarray(w).T + jnp.asarray(b)
            for k, (w, b) in classifiers.items()}


if __name__ == "__main__":
    key = jax.random.PRNGKey(0)

    B, D = 8, 32                        # batch, feature dim
    head_dims = {"head_1blocks": 16,    # a few linear-probe heads with
                 "head_2blocks": 24,    # different numbers of classes
                 "head_4blocks": 40}

    kx, *kws = jax.random.split(key, 1 + 2 * len(head_dims))
    x = jax.random.normal(kx, (B, D), dtype=jnp.float32)

    classifiers = {}
    for i, (name, C) in enumerate(head_dims.items()):
        kw, kb = kws[2 * i], kws[2 * i + 1]
        w = jax.random.normal(kw, (C, D), dtype=jnp.float32) * 0.02  # (out, in)
        b = jax.random.normal(kb, (C,), dtype=jnp.float32) * 0.01
        classifiers[name] = (w, b)

    model = AllClassifiers(classifiers)              # compute_dtype=f32 (exact)
    out = model(x)
    out = {k: jax.block_until_ready(v) for k, v in out.items()}

    # Verify against pure-JAX reference.
    ref = _ref_forward(classifiers, x)
    for k in out:
        assert out[k].shape == (B, head_dims[k]), (k, out[k].shape)
        assert jnp.allclose(out[k], ref[k], atol=1e-5, rtol=1e-5), k

    print("KERNEL_OK")
</pallas_src>

<mosaic_0001>
module attributes {stable_mosaic.version = 11 : i64} {
  func.func @_fused_heads_kernel(%arg0: i32, %arg1: i32, %arg2: i32, %arg3: memref<8x32xf32, #tpu.memory_space<vmem>>, %arg4: memref<32x128xf32, #tpu.memory_space<vmem>>, %arg5: memref<1x128xf32, #tpu.memory_space<vmem>>, %arg6: memref<8x128xf32, #tpu.memory_space<vmem>>, %arg7: memref<8x128xf32, #tpu.memory_space<vmem>>) attributes {dimension_semantics = [#tpu.dimension_semantics<parallel>, #tpu.dimension_semantics<parallel>, #tpu.dimension_semantics<arbitrary>], iteration_bounds = array<i64: 1, 1, 1>, scalar_prefetch = 0 : i64, scratch_operands = 1 : i64, tpu.core_type = #tpu.core_type<tc>, window_params = [{transform_indices = @transform_0, window_bounds = array<i64: 8, 32>}, {transform_indices = @transform_1, window_bounds = array<i64: 32, 128>}, {transform_indices = @transform_2, window_bounds = array<i64: 1, 128>}, {transform_indices = @transform_3, window_bounds = array<i64: 8, 128>}]} {
    %c0_i32 = arith.constant 0 : i32
    %0 = arith.cmpi eq, %arg2, %c0_i32 : i32
    %1 = arith.extui %0 : i1 to i32
    %c0_i32_0 = arith.constant 0 : i32
    %2 = arith.cmpi ne, %1, %c0_i32_0 : i32
    scf.if %2 {
      %cst_10 = arith.constant 0.000000e+00 : f32
      %12 = vector.broadcast %cst_10 : f32 to vector<8x128xf32>
      %c0_11 = arith.constant 0 : index
      %c0_12 = arith.constant 0 : index
      %13 = vector.load %arg7[%c0_11, %c0_12] : memref<8x128xf32, #tpu.memory_space<vmem>>, vector<8x128xf32>
      tpu.vector_store %arg7[%c0_11, %c0_12], %12 {strides = array<i32>} : memref<8x128xf32, #tpu.memory_space<vmem>>, vector<8x128xf32>,
    } else {
    }
    %c0 = arith.constant 0 : index
    %c0_1 = arith.constant 0 : index
    %3 = vector.load %arg7[%c0, %c0_1] : memref<8x128xf32, #tpu.memory_space<vmem>>, vector<8x128xf32>
    %c0_2 = arith.constant 0 : index
    %c0_3 = arith.constant 0 : index
    %4 = vector.load %arg3[%c0_2, %c0_3] : memref<8x32xf32, #tpu.memory_space<vmem>>, vector<8x32xf32>
    %c0_4 = arith.constant 0 : index
    %c0_5 = arith.constant 0 : index
    %5 = vector.load %arg4[%c0_4, %c0_5] : memref<32x128xf32, #tpu.memory_space<vmem>>, vector<32x128xf32>
    %cst = arith.constant dense<0.000000e+00> : vector<8x128xf32>
    %6 = tpu.matmul %4, %5, %cst {dimension_numbers = #tpu.dot_dimension_numbers<[1], [0], [0], [1], [0, 0, 1, 1], [], []>} : vector<8x32xf32>, vector<32x128xf32>, vector<8x128xf32> -> vector<8x128xf32>
    %7 = arith.addf %3, %6 : vector<8x128xf32>
    %c0_6 = arith.constant 0 : index
    %c0_7 = arith.constant 0 : index
    %8 = vector.load %arg7[%c0_6, %c0_7] : memref<8x128xf32, #tpu.memory_space<vmem>>, vector<8x128xf32>
    tpu.vector_store %arg7[%c0_6, %c0_7], %7 {strides = array<i32>} : memref<8x128xf32, #tpu.memory_space<vmem>>, vector<8x128xf32>,
    %c0_i32_8 = arith.constant 0 : i32
    %9 = arith.cmpi eq, %arg2, %c0_i32_8 : i32
    %10 = arith.extui %9 : i1 to i32
    %c0_i32_9 = arith.constant 0 : i32
    %11 = arith.cmpi ne, %10, %c0_i32_9 : i32
    scf.if %11 {
      %c0_10 = arith.constant 0 : index
      %c0_11 = arith.constant 0 : index
      %12 = vector.load %arg7[%c0_10, %c0_11] : memref<8x128xf32, #tpu.memory_space<vmem>>, vector<8x128xf32>
      %c0_12 = arith.constant 0 : index
      %c0_13 = arith.constant 0 : index
      %13 = vector.load %arg5[%c0_12, %c0_13] : memref<1x128xf32, #tpu.memory_space<vmem>>, vector<1x128xf32>
      %14 = vector.broadcast %13 : vector<1x128xf32> to vector<8x128xf32>
      %15 = arith.addf %12, %14 : vector<8x128xf32>
      %c0_14 = arith.constant 0 : index
      %c0_15 = arith.constant 0 : index
      %16 = vector.load %arg6[%c0_14, %c0_15] : memref<8x128xf32, #tpu.memory_space<vmem>>, vector<8x128xf32>
      tpu.vector_store %arg6[%c0_14, %c0_15], %15 {strides = array<i32>} : memref<8x128xf32, #tpu.memory_space<vmem>>, vector<8x128xf32>,
    } else {
    }
    return
  }
  func.func @transform_0(%arg0: i32, %arg1: i32, %arg2: i32) -> (i32, i32) {
    %c0_i32 = arith.constant 0 : i32
    return %arg0, %arg2 : i32, i32
  }
  func.func @transform_1(%arg0: i32, %arg1: i32, %arg2: i32) -> (i32, i32) {
    %c0_i32 = arith.constant 0 : i32
    return %arg2, %arg1 : i32, i32
  }
  func.func @transform_2(%arg0: i32, %arg1: i32, %arg2: i32) -> (i32, i32) {
    %c0_i32 = arith.constant 0 : i32
    %c0_i32_0 = arith.constant 0 : i32
    return %c0_i32, %arg1 : i32, i32
  }
  func.func @transform_3(%arg0: i32, %arg1: i32, %arg2: i32) -> (i32, i32) {
    %c0_i32 = arith.constant 0 : i32
    return %arg0, %arg1 : i32, i32
  }
}

</mosaic_0001>

<bundles_post_ra>
// kernel: tpu_custom_call.1
= control target key start
LH: loop header
LB: loop body
LE: loop exit
PB: predicated region body
PF: predicated region fallthrough
CT: control target
= control target key end

     0   :  { %8 = vsyncpa [#allocation4], 0  ;;  %s335_s0 = inlined_call_operand.hbm [shape: f32[8,32], index: 0, kind: input, shape index: {}]   ;;  %s336_s1 = inlined_call_operand.hbm [shape: f32[32,128], index: 1, kind: input, shape index: {}]   ;;  %s337_s2 = inlined_call_operand.vmem [shape: f32[1,128], index: 2, kind: input, shape index: {}]   ;;  %s338_s3 = inlined_call_operand.hbm [shape: f32[8,128], index: 3, kind: output, shape index: {}]  }
   0x1   :  { %9 = vsyncpa [#allocation7], 0 }
   0x2   :  { %10 = vsyncpa [#allocation5], 0  ;;  %s261_s12 = smov [#allocation3]   ;;  %s262_s14 = smov [#allocation6]  }
   0x3   :  { %s17_s13 = sshll.u32 %s261_s12, 4  ;;  %s26_s15 = sshll.u32 %s262_s14, 4  ;;  %s18_s13 = int_to_ptr.vmem [resolvable:$true] %s17_s13  ;;  %s289_s15 = int_to_ptr.vmem [resolvable:$true] %s26_s15 }
   0x4   :  { %s189_s18 = scalar_lea.hbm %s335_s0, 128 }
   0x5   :  { %p190_p0 = scmp.ne.s32.totalorder %s335_s0, %s189_s18  ;;  %p193_p1 = scmp.lt.u32.totalorder %s189_s18, %s335_s0 }
   0x7   :  { %p195_p2 = pnand %p193_p1, %p190_p0 }
   0x9   :  { %198 = shalt.err (!%p195_p2)
}
   0xa   :  { %s199_s23 = scalar_lea.vmem %s18_s13, 128  ;;  %p204_p4 = scmp.lt.s32.totalorder %s18_s13, %s18_s13 }
   0xb   :  { %p200_p3 = scmp.ne.s32.totalorder %s18_s13, %s199_s23  ;;  %p205_p5 = scmp.lt.s32.totalorder %s199_s23, %s199_s23 }
   0xd   :  { %p206_p6 = por %p205_p5, %p204_p4 }
   0xf   :  { %p207_p7 = pnand %p206_p6, %p200_p3 }
  0x11   :  { %210 = shalt.err (!%p207_p7)
}
  0x12   :  { %20 = dma.hbm_to_vmem [thread:$0]  %s335_s0, 128, %s18_s13, [#allocation4]  }
  0x13   :  { %s211_s28 = scalar_lea.hbm %s336_s1, 512 }
  0x14   :  { %p212_p8 = scmp.ne.s32.totalorder %s336_s1, %s211_s28  ;;  %p215_p9 = scmp.lt.u32.totalorder %s211_s28, %s336_s1 }
  0x16   :  { %p217_p10 = pnand %p215_p9, %p212_p8 }
  0x18   :  { %220 = shalt.err (!%p217_p10)
}
  0x19   :  { %s221_s6 = scalar_lea.vmem %s289_s15, 512  ;;  %p226_p12 = scmp.lt.s32.totalorder %s289_s15, %s289_s15 }
  0x1a   :  { %p222_p11 = scmp.ne.s32.totalorder %s289_s15, %s221_s6  ;;  %p227_p13 = scmp.lt.s32.totalorder %s221_s6, %s221_s6 }
  0x1c   :  { %p228_p0 = por %p227_p13, %p226_p12 }
  0x1e   :  { %p229_p1 = pnand %p228_p0, %p222_p11 }
  0x20   :  { %232 = shalt.err (!%p229_p1)
}
  0x21   :  { %s263_s0 = smov 128   ;;  %s264_s7 = smov 8  }
  0x22   :  { %32 = dma.hbm_to_vmem [thread:$0]  %s336_s1, 512, %s289_s15, [#allocation7], %s263_s0, %s263_s0, %s264_s7  }
  0x23   :  { %255 = dma.done.wait [#allocation4], 128  }
  0x24   :  { %256 = vsyncadd [#allocation4], 4294967168 }
  0x25   :  { %257 = dma.done.wait [#allocation7], 512  }
  0x26   :  { %258 = vsyncadd [#allocation7], 4294966784  ;;  %v265_v0 = vmov 0.0|0.0   ;;  %vm266_vm0 = vmmov 0   ;;  %v267_v1 = vmov 0.0   ;;  %v48_v2 = vld [vmem:[#allocation6] sm:$0xff] }
  0x27   :  { %175 = vmatprep.subr.bf16.mxu0 %v265_v0  ;;  %172 = vmatprep.mubr.msk.f32.mxu0 %vm266_vm0, %v267_v1  ;;  %v49_v3 = vld [vmem:[#allocation6 + $0x8] sm:$0xff]  ;;  %v50_v4 = vld [vmem:[#allocation6 + $0x10] sm:$0xff]  ;;  %v51_v6 = vld [vmem:[#allocation6 + $0x18] sm:$0xff]  ;;  %vm52_vm1 = vcmask 261120   ;;  %s268_s11 = smov [#allocation8]  }
  0x28   :  { %v176_v5 = vpack.c.bf16 %v49_v3, %v48_v2  ;;  %v179_v7 = vpack.c.bf16 %v51_v6, %v50_v4  ;;  %v47_v8 = vld [vmem:[#allocation3] sm:$0xff]  ;;  %s147_s12 = sshll.u32 %s268_s11, 4  ;;  %s148_s12 = int_to_ptr.vmem [resolvable:$true] %s147_s12 }
  0x29   :  { %v158_v9 = vld [vmem:[%s337_s2] ss:$0 sm:$0xff]  ;;  %s233_s13 = scalar_lea.vmem %s148_s12, 128  ;;  %p238_p3 = scmp.lt.s32.totalorder %s148_s12, %s148_s12 }
  0x2a   :  { %177 = vmatpush3.bf16.msra.mxu0 %v176_v5  ;;  %p234_p2 = scmp.ne.s32.totalorder %s148_s12, %s233_s13  ;;  %p239_p4 = scmp.lt.s32.totalorder %s233_s13, %s233_s13 }
  0x2b   :  { %178 = vmatprep.subr.bf16.mxu0 %v265_v0 }
  0x2c   :  { %p240_p5 = por %p239_p4, %p238_p3 }
  0x2e   :  { %180 = vmatpush3.bf16.msra.mxu0 %v179_v7  ;;  %p241_p6 = pnand %p240_p5, %p234_p2 }
  0x31   :  { %173 = vmatmul.mubr.msk.f32.vlgmr.msra.gmra.mrb[0].mxu0 %vm52_vm1, %v47_v8 }
 0x104   :  { %v122_v10 = vpop.f32.mrb[0].mxu0 }
 0x105   :  { %v139_v11 = vadd.f32 %v158_v9, %v122_v10  ;;  %v174_v12 = vpop.f32.mrb[1].mxu0 }
 0x107   :  { %140 = vst [vmem:[#allocation8] sm:$0xff] %v139_v11 }
 0x108   :  { %244 = shalt.err (!%p241_p6)
}
 0x109   :  { %s245_s16 = scalar_lea.hbm %s338_s3, 128 }
 0x10a   :  { %p246_p7 = scmp.ne.s32.totalorder %s338_s3, %s245_s16  ;;  %p249_p8 = scmp.lt.u32.totalorder %s245_s16, %s338_s3 }
 0x10c   :  { %p251_p9 = pnand %p249_p8, %p246_p7 }
 0x10e   :  { %254 = shalt.err (!%p251_p9)
}
 0x10f   :  { %150 = dma.vmem_to_hbm [thread:$0]  %s148_s12, 128, %s338_s3, [#allocation5]  }
 0x110   :  { %259 = dma.done.wait [#allocation5], 128  }
 0x111   :  { %260 = vsyncadd [#allocation5], 4294967168 }
 0x112   :  { %154 = vsyncpa [#allocation4], 1 }
 0x113   :  { %155 = vsyncpa [#allocation7], 1 }
 0x114   :  { %156 = vsyncpa [#allocation5], 1 }

</bundles_post_ra>
